<compile_context>
chip_gen: v7x
topology: tpu7x:2x2x1
jax: 0.10.0
libtpu: 0.0.40
codegen_flags: <defaults>
</compile_context>

<pallas_src>
import functools

import jax
import jax.numpy as jnp
from jax.experimental import pallas as pl
from jax.experimental.pallas import tpu as pltpu

EPS = 1e-10

# Scoped-VMEM limit requested from the compiler. 48 MiB is safe on every chip
# (v5e/v6e: 128 MiB physical VMEM; v7x: 64 MiB per TensorCore).
_VMEM_LIMIT_BYTES = 48 << 20
# Budget for one tile's working set: double-buffered input + output tiles plus
# the in-kernel f32 temporaries. Kept well under the scoped limit for headroom.
_TILE_BUDGET_BYTES = 24 << 20
# Aim for at least this many grid blocks when N allows: gives the pipeline
# depth for DMA/compute overlap and lets v7x use both TensorCores.
_MIN_GRID_BLOCKS = 8

# Sublane alignment of the second-to-last block dim, keyed by element size.
_SUBLANE_ALIGN = {4: 8, 2: 16, 1: 32}


def _l1norm_kernel(x_ref, o_ref, *, approx):
    x = x_ref[...]                                              # (tm, D) tile
    xf = x.astype(jnp.float32)
    norm = jnp.sum(jnp.abs(xf), axis=-1, keepdims=True) + EPS   # (tm, 1)
    inv = pl.reciprocal(norm, approx=approx)   # EUP slot (free) when approx
    o_ref[...] = (xf * inv).astype(o_ref.dtype)


def _choose_tm(N, D, per_row_bytes, align):
    """Tile height: as tall as the VMEM tile budget allows, but capped so the
    grid still has >= _MIN_GRID_BLOCKS blocks; always a multiple of `align`
    unless a single block covers all rows."""
    tm_vmem = max(align, (_TILE_BUDGET_BYTES // per_row_bytes) // align * align)
    tm_par = max(align, pl.cdiv(pl.cdiv(N, _MIN_GRID_BLOCKS), align) * align)
    tm = min(tm_vmem, tm_par)
    if tm >= N:
        # One block covers everything; block == full array dim always lowers
        # (no multiple-of-8 requirement when the block equals the dim).
        return N
    return tm


def l1norm(x, *, tm=None, approx_reciprocal=True):
    """Per-row L1 normalization: x / (sum(|x|, axis=1) + eps)."""
    assert x.ndim == 2, "expected (N, D) input"
    N, D = x.shape
    itemsize = jnp.dtype(x.dtype).itemsize
    align = _SUBLANE_ALIGN.get(itemsize, 8)

    # Per-row VMEM bytes: in + out tiles, double-buffered, + ~2 f32 temps/elem.
    per_row_bytes = D * (4 * itemsize + 8)
    if per_row_bytes * align > _TILE_BUDGET_BYTES:
        # TODO(synk): for very wide feature dims add a second "arbitrary" grid
        # axis over D with a two-pass scheme (accumulate |x| row sums in VMEM
        # scratch, then scale) instead of keeping all of D resident per block.
        raise NotImplementedError(
            f"D={D} is too wide for a single resident row-strip under the "
            f"{_TILE_BUDGET_BYTES >> 20} MiB tile budget")

    if tm is None:
        tm = _choose_tm(N, D, per_row_bytes, align)
    else:
        tm = int(tm)
        # Respect the sublane constraint: tm must be a multiple of `align`
        # unless the block covers the full row dimension.
        tm = N if tm >= N else max(align, (tm // align) * align)

    # Note: for D < 128 (like the (8, 32) demo) the output last dim is not
    # lane-dense, so stores are masked; at such sizes launch overhead dominates
    # anyway and XLA fusion would beat a dedicated kernel. D >= 128 multiples
    # get unmasked lane-dense stores with this layout.
    grid = (pl.cdiv(N, tm),)
    kernel = functools.partial(_l1norm_kernel, approx=approx_reciprocal)
    return pl.pallas_call(
        kernel,
        out_shape=jax.ShapeDtypeStruct((N, D), x.dtype),
        grid_spec=pltpu.PrefetchScalarGridSpec(
            num_scalar_prefetch=0,
            grid=grid,
            in_specs=[pl.BlockSpec((tm, D), lambda i: (i, 0))],
            out_specs=pl.BlockSpec((tm, D), lambda i: (i, 0)),
        ),
        compiler_params=pltpu.CompilerParams(
            dimension_semantics=("parallel",),
            vmem_limit_bytes=_VMEM_LIMIT_BYTES,
        ),
    )(x)


if __name__ == "__main__":
    key = jax.random.PRNGKey(0)
    k1, k2 = jax.random.split(key)

    # (1) Small shape consistent with the module's forward: (batch=8, feat=32).
    x_small = jax.random.normal(k1, (8, 32), dtype=jnp.float32)
    ref_small = x_small / (jnp.sum(jnp.abs(x_small), axis=1, keepdims=True) + EPS)

    out_approx = jax.block_until_ready(l1norm(x_small))           # perf path
    assert out_approx.shape == x_small.shape and out_approx.dtype == x_small.dtype
    assert jnp.allclose(out_approx, ref_small, atol=5e-3, rtol=5e-3)

    out_exact = jax.block_until_ready(l1norm(x_small, approx_reciprocal=False))
    assert jnp.allclose(out_exact, ref_small, atol=1e-6, rtol=1e-6)

    # (2) Larger shape exercising multi-block row tiling + ragged tail rows.
    x_big = jax.random.normal(k2, (260, 384), dtype=jnp.float32)
    ref_big = x_big / (jnp.sum(jnp.abs(x_big), axis=1, keepdims=True) + EPS)
    out_big = jax.block_until_ready(l1norm(x_big))
    assert out_big.shape == x_big.shape
    assert jnp.allclose(out_big, ref_big, atol=5e-3, rtol=5e-3)

    print("KERNEL_OK")
</pallas_src>

<mosaic_0001>
module attributes {stable_mosaic.version = 11 : i64} {
  func.func @_l1norm_kernel(%arg0: i32, %arg1: memref<8x32xf32, #tpu.memory_space<vmem>>, %arg2: memref<8x32xf32, #tpu.memory_space<vmem>>) attributes {dimension_semantics = [#tpu.dimension_semantics<parallel>], iteration_bounds = array<i64: 1>, scalar_prefetch = 0 : i64, scratch_operands = 0 : i64, tpu.core_type = #tpu.core_type<tc>, window_params = [{transform_indices = @transform_0, window_bounds = array<i64: 8, 32>}, {transform_indices = @transform_1, window_bounds = array<i64: 8, 32>}]} {
    %c0 = arith.constant 0 : index
    %c0_0 = arith.constant 0 : index
    %0 = vector.load %arg1[%c0, %c0_0] : memref<8x32xf32, #tpu.memory_space<vmem>>, vector<8x32xf32>
    %1 = math.absf %0 : vector<8x32xf32>
    %cst = arith.constant dense<0.000000e+00> : vector<8xf32>
    %2 = vector.multi_reduction <add>, %1, %cst [1] : vector<8x32xf32> to vector<8xf32>
    %3 = vector.shape_cast %2 : vector<8xf32> to vector<8x1xf32>
    %cst_1 = arith.constant 1.000000e-10 : f32
    %4 = vector.broadcast %cst_1 : f32 to vector<8x1xf32>
    %5 = arith.addf %3, %4 : vector<8x1xf32>
    %6 = tpu.reciprocal %5 {approx = true} : vector<8x1xf32> -> vector<8x1xf32>
    %7 = vector.broadcast %6 : vector<8x1xf32> to vector<8x32xf32>
    %8 = arith.mulf %0, %7 : vector<8x32xf32>
    %c0_2 = arith.constant 0 : index
    %c0_3 = arith.constant 0 : index
    %9 = vector.load %arg2[%c0_2, %c0_3] : memref<8x32xf32, #tpu.memory_space<vmem>>, vector<8x32xf32>
    tpu.vector_store %arg2[%c0_2, %c0_3], %8 {strides = array<i32>} : memref<8x32xf32, #tpu.memory_space<vmem>>, vector<8x32xf32>,
    return
  }
  func.func @transform_0(%arg0: i32) -> (i32, i32) {
    %c0_i32 = arith.constant 0 : i32
    %c0_i32_0 = arith.constant 0 : i32
    return %arg0, %c0_i32 : i32, i32
  }
  func.func @transform_1(%arg0: i32) -> (i32, i32) {
    %c0_i32 = arith.constant 0 : i32
    %c0_i32_0 = arith.constant 0 : i32
    return %arg0, %c0_i32 : i32, i32
  }
}

</mosaic_0001>

<bundles_post_ra>
// kernel: tpu_custom_call.1
= control target key start
LH: loop header
LB: loop body
LE: loop exit
PB: predicated region body
PF: predicated region fallthrough
CT: control target
= control target key end

     0   :  { %6 = vsyncpa [#allocation3], 0  ;;  %s134_s0 = inlined_call_operand.hbm [shape: f32[8,32], index: 0, kind: input, shape index: {}]   ;;  %s135_s1 = inlined_call_operand.hbm [shape: f32[8,32], index: 1, kind: output, shape index: {}]  }
   0x1   :  { %7 = vsyncpa [#allocation4], 0  ;;  %s98_s6 = smov [#allocation2]   ;;  %s50_s10 = scalar_lea.hbm %s134_s0, 128 }
   0x2   :  { %s14_s7 = sshll.u32 %s98_s6, 4  ;;  %p51_p0 = scmp.ne.s32.totalorder %s134_s0, %s50_s10  ;;  %s15_s7 = int_to_ptr.vmem [resolvable:$true] %s14_s7 }
   0x3   :  { %p54_p1 = scmp.lt.u32.totalorder %s50_s10, %s134_s0 }
   0x5   :  { %p56_p2 = pnand %p54_p1, %p51_p0 }
   0x7   :  { %59 = shalt.err (!%p56_p2)
}
   0x8   :  { %s60_s15 = scalar_lea.vmem %s15_s7, 128  ;;  %p65_p4 = scmp.lt.s32.totalorder %s15_s7, %s15_s7 }
   0x9   :  { %p61_p3 = scmp.ne.s32.totalorder %s15_s7, %s60_s15  ;;  %p66_p5 = scmp.lt.s32.totalorder %s60_s15, %s60_s15 }
   0xb   :  { %p67_p6 = por %p66_p5, %p65_p4 }
   0xd   :  { %p68_p7 = pnand %p67_p6, %p61_p3 }
   0xf   :  { %71 = shalt.err (!%p68_p7)
}
  0x10   :  { %17 = dma.hbm_to_vmem [thread:$0]  %s134_s0, 128, %s15_s7, [#allocation3]  }
  0x11   :  { %94 = dma.done.wait [#allocation3], 128  }
  0x12   :  { %95 = vsyncadd [#allocation3], 4294967168  ;;  %v21_v0 = vld [vmem:[#allocation2] sm:$0xff]  ;;  %vm23_vm0 = vcmask 261120   ;;  %s99_s18 = smov [#allocation5]  }
  0x13   :  { %v22_v1 = vand.u32 2147483647, %v21_v0  ;;  %s37_s19 = sshll.u32 %s99_s18, 4  ;;  %s38_s19 = int_to_ptr.vmem [resolvable:$true] %s37_s19 }
  0x14   :  { %s72_s20 = scalar_lea.vmem %s38_s19, 128  ;;  %p77_p9 = scmp.lt.s32.totalorder %s38_s19, %s38_s19 }
  0x15   :  { %v24_v2 = vsel %vm23_vm0, %v22_v1, 0.0  ;;  %p73_p8 = scmp.ne.s32.totalorder %s38_s19, %s72_s20  ;;  %p78_p10 = scmp.lt.s32.totalorder %s72_s20, %s72_s20 }
  0x16   :  { %25 = vadd.xlane.f32.xlu0 %v24_v2 }
  0x17   :  { %p79_p11 = por %p78_p10, %p77_p9 }
  0x19   :  { %p80_p12 = pnand %p79_p11, %p73_p8 }
  0xa3   :  { %v26_v3 = vpop.xlane.xlu0 %25 }
  0xa4   :  { %v27_v4 = vadd.f32 1e-10, %v26_v3 }
  0xa6   :  { %48 = vrcp.f32 %v27_v4 }
  0xb0   :  { %v49_v5 = vpop.eup %48 }
  0xb1   :  { %v29_v6 = vmul.f32 %v49_v5, %v21_v0 }
  0xb3   :  { %30 = vst.msk [vmem:[#allocation5] sm:$0xff] %vm23_vm0, %v29_v6 }
  0xb4   :  { %83 = shalt.err (!%p80_p12)
}
  0xb5   :  { %s84_s22 = scalar_lea.hbm %s135_s1, 128 }
  0xb6   :  { %p85_p13 = scmp.ne.s32.totalorder %s135_s1, %s84_s22  ;;  %p88_p0 = scmp.lt.u32.totalorder %s84_s22, %s135_s1 }
  0xb8   :  { %p90_p1 = pnand %p88_p0, %p85_p13 }
  0xba   :  { %93 = shalt.err (!%p90_p1)
}
  0xbb   :  { %40 = dma.vmem_to_hbm [thread:$0]  %s38_s19, 128, %s135_s1, [#allocation4]  }
  0xbc   :  { %96 = dma.done.wait [#allocation4], 128  }
  0xbd   :  { %97 = vsyncadd [#allocation4], 4294967168 }
  0xbe   :  { %44 = vsyncpa [#allocation3], 1 }
  0xbf   :  { %45 = vsyncpa [#allocation4], 1 }

</bundles_post_ra>
